<compile_context>
chip_gen: v5e
topology: v5e:2x2
jax: 0.10.0
libtpu: 0.0.40
codegen_flags: <defaults>
</compile_context>

<pallas_src>
import math

import jax
import jax.numpy as jnp
import numpy as np
from jax import lax
from jax.experimental import pallas as pl
from jax.experimental.pallas import tpu as pltpu

# ---- small LlamaConfig-equivalent constants -------------------------------
BATCH = 2
SEQ = 8
HIDDEN = 32
NUM_HEADS = 4
NUM_KV_HEADS = 4          # the module's forward has no repeat_kv
HEAD_DIM = HIDDEN // NUM_HEADS
INTER = 64                # intermediate_size
RMS_EPS = 1e-6
ROPE_THETA = 10000.0

assert NUM_KV_HEADS == NUM_HEADS, "forward path has no repeat_kv; heads must match"


def _rotate_half(x):
    """rotate_half on the last (head_dim) axis; applied once per q/k tensor."""
    half = x.shape[-1] // 2
    return jnp.concatenate([-x[..., half:], x[..., :half]], axis=-1)


# ---------------------------------------------------------------------------
# Fused decoder-layer kernel (single invocation, batch folded into rows).
# ---------------------------------------------------------------------------
def decoder_layer_kernel(x_ref, mask_ref, cos_ref, sin_ref,
                         ln1_ref, ln2_ref,
                         wqkv_ref, wo_ref, wgu_ref, wd_ref,
                         out_ref):
    x = x_ref[...].astype(jnp.float32)               # (N, H), N = B*S (residual)
    n_rows = x.shape[0]

    # ---- input RMSNorm (LlamaRMSNorm) ----
    var = jnp.mean(x * x, axis=-1, keepdims=True)
    xn = (x * lax.rsqrt(var + RMS_EPS)) * ln1_ref[...]          # (N, H)

    # ---- fused, head-batched q/k/v projection ----
    # wqkv_ref: (NH, H, 3*Dh); the 1/sqrt(Dh) scale is pre-folded into the
    # q columns.  One batched dot_general instead of three matmuls + per-head
    # slicing/relayouts.
    xnb = jnp.broadcast_to(xn[None], (NUM_HEADS, n_rows, HIDDEN))
    qkv = jnp.einsum('hnc,hcd->hnd', xnb, wqkv_ref[...],
                     preferred_element_type=jnp.float32)        # (NH, N, 3*Dh)
    q = qkv[..., :HEAD_DIM]
    k = qkv[..., HEAD_DIM:2 * HEAD_DIM]
    v = qkv[..., 2 * HEAD_DIM:]

    # ---- RoPE (applied once on the head-batched tensors) ----
    cos = cos_ref[...][None]                                    # (1, N, Dh)
    sin = sin_ref[...][None]
    q = q * cos + _rotate_half(q) * sin
    k = k * cos + _rotate_half(k) * sin

    # ---- attention: heads as the dot_general batch dim ----
    # mask_ref is an (N, N) additive mask that is block-diagonal over batches,
    # so cross-batch keys get probability exactly 0 and the result equals the
    # per-batch computation.
    s = jnp.einsum('hqd,hkd->hqk', q, k,
                   preferred_element_type=jnp.float32)          # (NH, N, N)
    s = s + mask_ref[...][None]
    m = jnp.max(s, axis=-1, keepdims=True)
    e = jnp.exp(s - m)
    p = e * pl.reciprocal(jnp.sum(e, axis=-1, keepdims=True), approx=True)
    ctx = jnp.einsum('hqk,hkd->hqd', p, v,
                     preferred_element_type=jnp.float32)        # (NH, N, Dh)

    # ---- output projection with the head dim carried by the weight ----
    # wo_ref: (NH, Dh, H); summing the per-head partial products over the
    # leading (untiled) axis is cheap vector adds.
    o = jnp.einsum('hnd,hdo->hno', ctx, wo_ref[...],
                   preferred_element_type=jnp.float32).sum(axis=0)   # (N, H)

    # ---- first residual ----
    h1 = x + o

    # ---- post-attention RMSNorm ----
    var2 = jnp.mean(h1 * h1, axis=-1, keepdims=True)
    hn = (h1 * lax.rsqrt(var2 + RMS_EPS)) * ln2_ref[...]

    # ---- MLP: down_proj( silu(gate_proj(x)) * up_proj(x) ) ----
    # gate/up fused -> the matmul output is exactly 128 lanes (lane-dense).
    gu = jnp.dot(hn, wgu_ref[...], preferred_element_type=jnp.float32)  # (N, 2*INTER)
    g = gu[:, :INTER]
    u = gu[:, INTER:]
    d = jnp.dot(jax.nn.silu(g) * u, wd_ref[...],
                preferred_element_type=jnp.float32)             # (N, H)

    # ---- second residual ----
    out_ref[...] = (h1 + d).astype(out_ref.dtype)


# ---------------------------------------------------------------------------
# Wrapper: fold batch into rows, fuse/re-layout weights, build the folded mask.
# ---------------------------------------------------------------------------
def _full_spec(shape):
    n = len(shape)
    return pl.BlockSpec(shape, lambda i, _n=n: (0,) * _n)


@jax.jit
def llama_decoder_layer(hidden, attn_mask, cos, sin,
                        ln1, ln2, wq, wk, wv, wo, wg, wu, wd):
    B, S, H = hidden.shape
    N = B * S
    scale = 1.0 / math.sqrt(HEAD_DIM)

    x2d = hidden.reshape(N, H)

    # Fused per-head qkv weight (NH, H, 3*Dh); fold the softmax scale into q.
    wq_h = (wq * scale).reshape(H, NUM_HEADS, HEAD_DIM).transpose(1, 0, 2)
    wk_h = wk.reshape(H, NUM_KV_HEADS, HEAD_DIM).transpose(1, 0, 2)
    wv_h = wv.reshape(H, NUM_KV_HEADS, HEAD_DIM).transpose(1, 0, 2)
    wqkv_h = jnp.concatenate([wq_h, wk_h, wv_h], axis=-1)       # (NH, H, 3*Dh)
    wo_h = wo.reshape(NUM_HEADS, HEAD_DIM, H)                   # (NH, Dh, H)
    wgu = jnp.concatenate([wg, wu], axis=1)                     # (H, 2*INTER)

    # RoPE tables replicated over the folded batch dimension (position = arange(S)).
    cos_n = jnp.tile(cos, (B, 1)).astype(jnp.float32)           # (N, Dh)
    sin_n = jnp.tile(sin, (B, 1)).astype(jnp.float32)

    # Fold the (B, 1, S, S) additive attention mask into a single (N, N)
    # block-diagonal additive mask (batch-separating entries = -1e9).
    rows = jnp.arange(N)
    rb, ri = rows // S, rows % S
    m3 = attn_mask[:, 0].astype(jnp.float32)                    # (B, S, S)
    gathered = m3[rb[:, None], ri[:, None], ri[None, :]]        # (N, N)
    same = rb[:, None] == rb[None, :]
    mask_nn = jnp.where(same, gathered, jnp.float32(-1e9))

    ln1_2d = ln1.reshape(1, H).astype(jnp.float32)
    ln2_2d = ln2.reshape(1, H).astype(jnp.float32)

    grid_spec = pltpu.PrefetchScalarGridSpec(
        num_scalar_prefetch=0,
        grid=(1,),                                   # single invocation
        in_specs=[
            _full_spec((N, H)),                      # hidden (rows = B*S)
            _full_spec((N, N)),                      # folded additive mask
            _full_spec((N, HEAD_DIM)),               # cos
            _full_spec((N, HEAD_DIM)),               # sin
            _full_spec((1, H)), _full_spec((1, H)),  # RMSNorm weights
            _full_spec(wqkv_h.shape),                # fused qkv weight
            _full_spec(wo_h.shape),                  # per-head o_proj weight
            _full_spec(wgu.shape),                   # fused gate|up weight
            _full_spec(wd.shape),                    # down_proj weight
        ],
        out_specs=pl.BlockSpec((N, H), lambda i: (0, 0)),
    )
    out2d = pl.pallas_call(
        decoder_layer_kernel,
        out_shape=jax.ShapeDtypeStruct((N, H), hidden.dtype),
        grid_spec=grid_spec,
        compiler_params=pltpu.CompilerParams(
            dimension_semantics=("arbitrary",)),
    )(x2d, mask_nn, cos_n, sin_n, ln1_2d, ln2_2d, wqkv_h, wo_h, wgu, wd)
    return out2d.reshape(B, S, H)


# ---------------------------------------------------------------------------
# Pure-JAX reference (mirrors the PyTorch forward) for verification.
# ---------------------------------------------------------------------------
def reference(hidden, mask, cos, sin, ln1, ln2, wq, wk, wv, wo, wg, wu, wd):
    x = hidden.astype(jnp.float32)
    B, S, H = x.shape

    def rms(t, w):
        var = jnp.mean(t * t, axis=-1, keepdims=True)
        return w * (t * lax.rsqrt(var + RMS_EPS))

    xn = rms(x, ln1)
    q = (xn @ wq).reshape(B, S, NUM_HEADS, HEAD_DIM).transpose(0, 2, 1, 3)
    k = (xn @ wk).reshape(B, S, NUM_KV_HEADS, HEAD_DIM).transpose(0, 2, 1, 3)
    v = (xn @ wv).reshape(B, S, NUM_KV_HEADS, HEAD_DIM).transpose(0, 2, 1, 3)
    c = cos[None, None]
    s = sin[None, None]
    q = q * c + _rotate_half(q) * s
    k = k * c + _rotate_half(k) * s
    scores = jnp.einsum('bhqd,bhkd->bhqk', q, k) / math.sqrt(HEAD_DIM) + mask
    p = jax.nn.softmax(scores.astype(jnp.float32), axis=-1)
    attn = jnp.einsum('bhqk,bhkd->bhqd', p, v).transpose(0, 2, 1, 3).reshape(B, S, H)
    h1 = x + attn @ wo
    hn = rms(h1, ln2)
    mlp = (jax.nn.silu(hn @ wg) * (hn @ wu)) @ wd
    return h1 + mlp


if __name__ == "__main__":
    key = jax.random.PRNGKey(0)
    ks = jax.random.split(key, 9)
    wscale = 0.05

    hidden = jax.random.normal(ks[0], (BATCH, SEQ, HIDDEN), jnp.float32)

    wq = jax.random.normal(ks[1], (HIDDEN, NUM_HEADS * HEAD_DIM), jnp.float32) * wscale
    wk = jax.random.normal(ks[2], (HIDDEN, NUM_KV_HEADS * HEAD_DIM), jnp.float32) * wscale
    wv = jax.random.normal(ks[3], (HIDDEN, NUM_KV_HEADS * HEAD_DIM), jnp.float32) * wscale
    wo = jax.random.normal(ks[4], (NUM_HEADS * HEAD_DIM, HIDDEN), jnp.float32) * wscale
    wg = jax.random.normal(ks[5], (HIDDEN, INTER), jnp.float32) * wscale
    wu = jax.random.normal(ks[6], (HIDDEN, INTER), jnp.float32) * wscale
    wd = jax.random.normal(ks[7], (INTER, HIDDEN), jnp.float32) * wscale
    ln1 = jnp.ones((HIDDEN,), jnp.float32)      # LlamaRMSNorm init = ones
    ln2 = jnp.ones((HIDDEN,), jnp.float32)

    # RoPE cos/sin tables for position_ids = arange(SEQ) (LlamaRotaryEmbedding).
    inv_freq = 1.0 / (ROPE_THETA ** (np.arange(0, HEAD_DIM, 2, dtype=np.float32) / HEAD_DIM))
    pos = np.arange(SEQ, dtype=np.float32)
    freqs = np.einsum('i,j->ij', pos, inv_freq)
    emb = np.concatenate([freqs, freqs], axis=-1)
    cos = jnp.asarray(np.cos(emb), jnp.float32)        # (SEQ, HEAD_DIM)
    sin = jnp.asarray(np.sin(emb), jnp.float32)

    # Causal additive attention mask (batch, 1, seq, seq).
    causal = np.triu(np.full((SEQ, SEQ), -1e9, dtype=np.float32), k=1)
    mask = jnp.broadcast_to(jnp.asarray(causal)[None, None], (BATCH, 1, SEQ, SEQ))

    out = llama_decoder_layer(hidden, mask, cos, sin,
                              ln1, ln2, wq, wk, wv, wo, wg, wu, wd)
    out = jax.block_until_ready(out)

    ref = reference(hidden, mask, cos, sin,
                    ln1, ln2, wq, wk, wv, wo, wg, wu, wd)
    np.testing.assert_allclose(np.asarray(out), np.asarray(ref), rtol=1e-3, atol=1e-3)

    print("KERNEL_OK")
</pallas_src>

<mosaic_0001>
module attributes {stable_mosaic.version = 11 : i64} {
  func.func @decoder_layer_kernel(%arg0: i32, %arg1: memref<16x32xf32, #tpu.memory_space<vmem>>, %arg2: memref<16x16xf32, #tpu.memory_space<vmem>>, %arg3: memref<16x8xf32, #tpu.memory_space<vmem>>, %arg4: memref<16x8xf32, #tpu.memory_space<vmem>>, %arg5: memref<1x32xf32, #tpu.memory_space<vmem>>, %arg6: memref<1x32xf32, #tpu.memory_space<vmem>>, %arg7: memref<4x32x24xf32, #tpu.memory_space<vmem>>, %arg8: memref<4x8x32xf32, #tpu.memory_space<vmem>>, %arg9: memref<32x128xf32, #tpu.memory_space<vmem>>, %arg10: memref<64x32xf32, #tpu.memory_space<vmem>>, %arg11: memref<16x32xf32, #tpu.memory_space<vmem>>) attributes {dimension_semantics = [#tpu.dimension_semantics<arbitrary>], iteration_bounds = array<i64: 1>, scalar_prefetch = 0 : i64, scratch_operands = 0 : i64, tpu.core_type = #tpu.core_type<tc>, window_params = [{pipeline_mode = #tpu.pipeline_mode<synchronous>, transform_indices = @transform_0, window_bounds = array<i64: 16, 32>}, {pipeline_mode = #tpu.pipeline_mode<synchronous>, transform_indices = @transform_1, window_bounds = array<i64: 16, 16>}, {pipeline_mode = #tpu.pipeline_mode<synchronous>, transform_indices = @transform_2, window_bounds = array<i64: 16, 8>}, {pipeline_mode = #tpu.pipeline_mode<synchronous>, transform_indices = @transform_3, window_bounds = array<i64: 16, 8>}, {pipeline_mode = #tpu.pipeline_mode<synchronous>, transform_indices = @transform_4, window_bounds = array<i64: 1, 32>}, {pipeline_mode = #tpu.pipeline_mode<synchronous>, transform_indices = @transform_5, window_bounds = array<i64: 1, 32>}, {pipeline_mode = #tpu.pipeline_mode<synchronous>, transform_indices = @transform_6, window_bounds = array<i64: 4, 32, 24>}, {pipeline_mode = #tpu.pipeline_mode<synchronous>, transform_indices = @transform_7, window_bounds = array<i64: 4, 8, 32>}, {pipeline_mode = #tpu.pipeline_mode<synchronous>, transform_indices = @transform_8, window_bounds = array<i64: 32, 128>}, {pipeline_mode = #tpu.pipeline_mode<synchronous>, transform_indices = @transform_9, window_bounds = array<i64: 64, 32>}, {pipeline_mode = #tpu.pipeline_mode<synchronous>, transform_indices = @transform_10, window_bounds = array<i64: 16, 32>}]} {
    %c0 = arith.constant 0 : index
    %c0_0 = arith.constant 0 : index
    %0 = vector.load %arg1[%c0, %c0_0] : memref<16x32xf32, #tpu.memory_space<vmem>>, vector<16x32xf32>
    %1 = arith.mulf %0, %0 : vector<16x32xf32>
    %cst = arith.constant dense<0.000000e+00> : vector<16xf32>
    %2 = vector.multi_reduction <add>, %1, %cst [1] : vector<16x32xf32> to vector<16xf32>
    %3 = vector.shape_cast %2 : vector<16xf32> to vector<16x1xf32>
    %cst_1 = arith.constant 3.200000e+01 : f32
    %4 = vector.broadcast %cst_1 : f32 to vector<16x1xf32>
    %5 = arith.divf %3, %4 : vector<16x1xf32>
    %cst_2 = arith.constant 9.99999997E-7 : f32
    %6 = vector.broadcast %cst_2 : f32 to vector<16x1xf32>
    %7 = arith.addf %5, %6 : vector<16x1xf32>
    %8 = math.rsqrt %7 : vector<16x1xf32>
    %9 = vector.broadcast %8 : vector<16x1xf32> to vector<16x32xf32>
    %10 = arith.mulf %0, %9 : vector<16x32xf32>
    %c0_3 = arith.constant 0 : index
    %c0_4 = arith.constant 0 : index
    %11 = vector.load %arg5[%c0_3, %c0_4] : memref<1x32xf32, #tpu.memory_space<vmem>>, vector<1x32xf32>
    %12 = vector.broadcast %11 : vector<1x32xf32> to vector<16x32xf32>
    %13 = arith.mulf %10, %12 : vector<16x32xf32>
    %14 = vector.shape_cast %13 : vector<16x32xf32> to vector<1x16x32xf32>
    %15 = vector.shape_cast %14 : vector<1x16x32xf32> to vector<1x16x32xf32>
    %16 = vector.broadcast %15 : vector<1x16x32xf32> to vector<4x16x32xf32>
    %c0_5 = arith.constant 0 : index
    %c0_6 = arith.constant 0 : index
    %c0_7 = arith.constant 0 : index
    %17 = vector.load %arg7[%c0_5, %c0_6, %c0_7] : memref<4x32x24xf32, #tpu.memory_space<vmem>>, vector<4x32x24xf32>
    "tpu.trace_start"() <{level = 10 : i32, message = "hnc,hcd->hnd"}> : () -> ()
    %cst_8 = arith.constant dense<0.000000e+00> : vector<4x16x24xf32>
    %18 = tpu.matmul %16, %17, %cst_8 {dimension_numbers = #tpu.dot_dimension_numbers<[2], [1], [1], [2], [0, 0, 0, 1, 1, 2], [0], [0]>} : vector<4x16x32xf32>, vector<4x32x24xf32>, vector<4x16x24xf32> -> vector<4x16x24xf32>
    "tpu.trace_stop"() : () -> ()
    %19 = vector.extract_strided_slice %18 {offsets = [0, 0, 0], sizes = [4, 16, 8], strides = [1, 1, 1]} : vector<4x16x24xf32> to vector<4x16x8xf32>
    %20 = vector.extract_strided_slice %18 {offsets = [0, 0, 8], sizes = [4, 16, 8], strides = [1, 1, 1]} : vector<4x16x24xf32> to vector<4x16x8xf32>
    %21 = vector.extract_strided_slice %18 {offsets = [0, 0, 16], sizes = [4, 16, 8], strides = [1, 1, 1]} : vector<4x16x24xf32> to vector<4x16x8xf32>
    %c0_9 = arith.constant 0 : index
    %c0_10 = arith.constant 0 : index
    %22 = vector.load %arg3[%c0_9, %c0_10] : memref<16x8xf32, #tpu.memory_space<vmem>>, vector<16x8xf32>
    %23 = vector.shape_cast %22 : vector<16x8xf32> to vector<1x16x8xf32>
    %c0_11 = arith.constant 0 : index
    %c0_12 = arith.constant 0 : index
    %24 = vector.load %arg4[%c0_11, %c0_12] : memref<16x8xf32, #tpu.memory_space<vmem>>, vector<16x8xf32>
    %25 = vector.shape_cast %24 : vector<16x8xf32> to vector<1x16x8xf32>
    %26 = vector.broadcast %23 : vector<1x16x8xf32> to vector<4x16x8xf32>
    %27 = arith.mulf %19, %26 : vector<4x16x8xf32>
    %28 = vector.extract_strided_slice %19 {offsets = [0, 0, 4], sizes = [4, 16, 4], strides = [1, 1, 1]} : vector<4x16x8xf32> to vector<4x16x4xf32>
    %cst_13 = arith.constant 0.000000e+00 : f32
    %29 = vector.broadcast %cst_13 : f32 to vector<4x16x4xf32>
    %30 = arith.subf %29, %28 : vector<4x16x4xf32>
    %31 = vector.extract_strided_slice %19 {offsets = [0, 0, 0], sizes = [4, 16, 4], strides = [1, 1, 1]} : vector<4x16x8xf32> to vector<4x16x4xf32>
    %32 = tpu.concatenate %30, %31 in 2 : vector<4x16x4xf32>, vector<4x16x4xf32> -> vector<4x16x8xf32>
    %33 = vector.broadcast %25 : vector<1x16x8xf32> to vector<4x16x8xf32>
    %34 = arith.mulf %32, %33 : vector<4x16x8xf32>
    %35 = arith.addf %27, %34 : vector<4x16x8xf32>
    %36 = vector.broadcast %23 : vector<1x16x8xf32> to vector<4x16x8xf32>
    %37 = arith.mulf %20, %36 : vector<4x16x8xf32>
    %38 = vector.extract_strided_slice %20 {offsets = [0, 0, 4], sizes = [4, 16, 4], strides = [1, 1, 1]} : vector<4x16x8xf32> to vector<4x16x4xf32>
    %cst_14 = arith.constant 0.000000e+00 : f32
    %39 = vector.broadcast %cst_14 : f32 to vector<4x16x4xf32>
    %40 = arith.subf %39, %38 : vector<4x16x4xf32>
    %41 = vector.extract_strided_slice %20 {offsets = [0, 0, 0], sizes = [4, 16, 4], strides = [1, 1, 1]} : vector<4x16x8xf32> to vector<4x16x4xf32>
    %42 = tpu.concatenate %40, %41 in 2 : vector<4x16x4xf32>, vector<4x16x4xf32> -> vector<4x16x8xf32>
    %43 = vector.broadcast %25 : vector<1x16x8xf32> to vector<4x16x8xf32>
    %44 = arith.mulf %42, %43 : vector<4x16x8xf32>
    %45 = arith.addf %37, %44 : vector<4x16x8xf32>
    "tpu.trace_start"() <{level = 10 : i32, message = "hqd,hkd->hqk"}> : () -> ()
    %cst_15 = arith.constant dense<0.000000e+00> : vector<4x16x16xf32>
    %46 = tpu.matmul %35, %45, %cst_15 {dimension_numbers = #tpu.dot_dimension_numbers<[2], [2], [1], [1], [0, 0, 0, 1, 1, 1], [0], [0]>} : vector<4x16x8xf32>, vector<4x16x8xf32>, vector<4x16x16xf32> -> vector<4x16x16xf32>
    "tpu.trace_stop"() : () -> ()
    %c0_16 = arith.constant 0 : index
    %c0_17 = arith.constant 0 : index
    %47 = vector.load %arg2[%c0_16, %c0_17] : memref<16x16xf32, #tpu.memory_space<vmem>>, vector<16x16xf32>
    %48 = vector.shape_cast %47 : vector<16x16xf32> to vector<1x16x16xf32>
    %49 = vector.broadcast %48 : vector<1x16x16xf32> to vector<4x16x16xf32>
    %50 = arith.addf %46, %49 : vector<4x16x16xf32>
    %cst_18 = arith.constant dense<0xFF800000> : vector<4x16xf32>
    %51 = vector.multi_reduction <maximumf>, %50, %cst_18 [2] : vector<4x16x16xf32> to vector<4x16xf32>
    %52 = vector.shape_cast %51 : vector<4x16xf32> to vector<4x16x1xf32>
    %53 = vector.broadcast %52 : vector<4x16x1xf32> to vector<4x16x16xf32>
    %54 = arith.subf %50, %53 : vector<4x16x16xf32>
    %55 = math.exp %54 : vector<4x16x16xf32>
    %cst_19 = arith.constant dense<0.000000e+00> : vector<4x16xf32>
    %56 = vector.multi_reduction <add>, %55, %cst_19 [2] : vector<4x16x16xf32> to vector<4x16xf32>
    %57 = vector.shape_cast %56 : vector<4x16xf32> to vector<4x16x1xf32>
    %58 = tpu.reciprocal %57 {approx = true} : vector<4x16x1xf32> -> vector<4x16x1xf32>
    %59 = vector.broadcast %58 : vector<4x16x1xf32> to vector<4x16x16xf32>
    %60 = arith.mulf %55, %59 : vector<4x16x16xf32>
    "tpu.trace_start"() <{level = 10 : i32, message = "hqk,hkd->hqd"}> : () -> ()
    %cst_20 = arith.constant dense<0.000000e+00> : vector<4x16x8xf32>
    %61 = tpu.matmul %60, %21, %cst_20 {dimension_numbers = #tpu.dot_dimension_numbers<[2], [1], [1], [2], [0, 0, 0, 1, 1, 2], [0], [0]>} : vector<4x16x16xf32>, vector<4x16x8xf32>, vector<4x16x8xf32> -> vector<4x16x8xf32>
    "tpu.trace_stop"() : () -> ()
    %c0_21 = arith.constant 0 : index
    %c0_22 = arith.constant 0 : index
    %c0_23 = arith.constant 0 : index
    %62 = vector.load %arg8[%c0_21, %c0_22, %c0_23] : memref<4x8x32xf32, #tpu.memory_space<vmem>>, vector<4x8x32xf32>
    "tpu.trace_start"() <{level = 10 : i32, message = "hnd,hdo->hno"}> : () -> ()
    %cst_24 = arith.constant dense<0.000000e+00> : vector<4x16x32xf32>
    %63 = tpu.matmul %61, %62, %cst_24 {dimension_numbers = #tpu.dot_dimension_numbers<[2], [1], [1], [2], [0, 0, 0, 1, 1, 2], [0], [0]>} : vector<4x16x8xf32>, vector<4x8x32xf32>, vector<4x16x32xf32> -> vector<4x16x32xf32>
    "tpu.trace_stop"() : () -> ()
    %cst_25 = arith.constant dense<0.000000e+00> : vector<16x32xf32>
    %64 = vector.multi_reduction <add>, %63, %cst_25 [0] : vector<4x16x32xf32> to vector<16x32xf32>
    %65 = arith.addf %0, %64 : vector<16x32xf32>
    %66 = arith.mulf %65, %65 : vector<16x32xf32>
    %cst_26 = arith.constant dense<0.000000e+00> : vector<16xf32>
    %67 = vector.multi_reduction <add>, %66, %cst_26 [1] : vector<16x32xf32> to vector<16xf32>
    %68 = vector.shape_cast %67 : vector<16xf32> to vector<16x1xf32>
    %cst_27 = arith.constant 3.200000e+01 : f32
    %69 = vector.broadcast %cst_27 : f32 to vector<16x1xf32>
    %70 = arith.divf %68, %69 : vector<16x1xf32>
    %cst_28 = arith.constant 9.99999997E-7 : f32
    %71 = vector.broadcast %cst_28 : f32 to vector<16x1xf32>
    %72 = arith.addf %70, %71 : vector<16x1xf32>
    %73 = math.rsqrt %72 : vector<16x1xf32>
    %74 = vector.broadcast %73 : vector<16x1xf32> to vector<16x32xf32>
    %75 = arith.mulf %65, %74 : vector<16x32xf32>
    %c0_29 = arith.constant 0 : index
    %c0_30 = arith.constant 0 : index
    %76 = vector.load %arg6[%c0_29, %c0_30] : memref<1x32xf32, #tpu.memory_space<vmem>>, vector<1x32xf32>
    %77 = vector.broadcast %76 : vector<1x32xf32> to vector<16x32xf32>
    %78 = arith.mulf %75, %77 : vector<16x32xf32>
    %c0_31 = arith.constant 0 : index
    %c0_32 = arith.constant 0 : index
    %79 = vector.load %arg9[%c0_31, %c0_32] : memref<32x128xf32, #tpu.memory_space<vmem>>, vector<32x128xf32>
    %cst_33 = arith.constant dense<0.000000e+00> : vector<16x128xf32>
    %80 = tpu.matmul %78, %79, %cst_33 {dimension_numbers = #tpu.dot_dimension_numbers<[1], [0], [0], [1], [0, 0, 1, 1], [], []>} : vector<16x32xf32>, vector<32x128xf32>, vector<16x128xf32> -> vector<16x128xf32>
    %81 = vector.extract_strided_slice %80 {offsets = [0, 0], sizes = [16, 64], strides = [1, 1]} : vector<16x128xf32> to vector<16x64xf32>
    %82 = vector.extract_strided_slice %80 {offsets = [0, 64], sizes = [16, 64], strides = [1, 1]} : vector<16x128xf32> to vector<16x64xf32>
    %83 = arith.negf %81 : vector<16x64xf32>
    %84 = math.exp %83 : vector<16x64xf32>
    %cst_34 = arith.constant 1.000000e+00 : f32
    %85 = vector.broadcast %cst_34 : f32 to vector<16x64xf32>
    %86 = arith.addf %85, %84 : vector<16x64xf32>
    %87 = arith.divf %85, %86 : vector<16x64xf32>
    %88 = arith.mulf %81, %87 : vector<16x64xf32>
    %89 = arith.mulf %88, %82 : vector<16x64xf32>
    %c0_35 = arith.constant 0 : index
    %c0_36 = arith.constant 0 : index
    %90 = vector.load %arg10[%c0_35, %c0_36] : memref<64x32xf32, #tpu.memory_space<vmem>>, vector<64x32xf32>
    %cst_37 = arith.constant dense<0.000000e+00> : vector<16x32xf32>
    %91 = tpu.matmul %89, %90, %cst_37 {dimension_numbers = #tpu.dot_dimension_numbers<[1], [0], [0], [1], [0, 0, 1, 1], [], []>} : vector<16x64xf32>, vector<64x32xf32>, vector<16x32xf32> -> vector<16x32xf32>
    %92 = arith.addf %65, %91 : vector<16x32xf32>
    %c0_38 = arith.constant 0 : index
    %c0_39 = arith.constant 0 : index
    %93 = vector.load %arg11[%c0_38, %c0_39] : memref<16x32xf32, #tpu.memory_space<vmem>>, vector<16x32xf32>
    tpu.vector_store %arg11[%c0_38, %c0_39], %92 {strides = array<i32>} : memref<16x32xf32, #tpu.memory_space<vmem>>, vector<16x32xf32>,
    return
  }
  func.func @transform_0(%arg0: i32) -> (i32, i32) {
    %c0_i32 = arith.constant 0 : i32
    %c0_i32_0 = arith.constant 0 : i32
    %c0_i32_1 = arith.constant 0 : i32
    return %c0_i32, %c0_i32_0 : i32, i32
  }
  func.func @transform_1(%arg0: i32) -> (i32, i32) {
    %c0_i32 = arith.constant 0 : i32
    %c0_i32_0 = arith.constant 0 : i32
    %c0_i32_1 = arith.constant 0 : i32
    return %c0_i32, %c0_i32_0 : i32, i32
  }
  func.func @transform_2(%arg0: i32) -> (i32, i32) {
    %c0_i32 = arith.constant 0 : i32
    %c0_i32_0 = arith.constant 0 : i32
    %c0_i32_1 = arith.constant 0 : i32
    return %c0_i32, %c0_i32_0 : i32, i32
  }
  func.func @transform_3(%arg0: i32) -> (i32, i32) {
    %c0_i32 = arith.constant 0 : i32
    %c0_i32_0 = arith.constant 0 : i32
    %c0_i32_1 = arith.constant 0 : i32
    return %c0_i32, %c0_i32_0 : i32, i32
  }
  func.func @transform_4(%arg0: i32) -> (i32, i32) {
    %c0_i32 = arith.constant 0 : i32
    %c0_i32_0 = arith.constant 0 : i32
    %c0_i32_1 = arith.constant 0 : i32
    return %c0_i32, %c0_i32_0 : i32, i32
  }
  func.func @transform_5(%arg0: i32) -> (i32, i32) {
    %c0_i32 = arith.constant 0 : i32
    %c0_i32_0 = arith.constant 0 : i32
    %c0_i32_1 = arith.constant 0 : i32
    return %c0_i32, %c0_i32_0 : i32, i32
  }
  func.func @transform_6(%arg0: i32) -> (i32, i32, i32) {
    %c0_i32 = arith.constant 0 : i32
    %c0_i32_0 = arith.constant 0 : i32
    %c0_i32_1 = arith.constant 0 : i32
    %c0_i32_2 = arith.constant 0 : i32
    return %c0_i32, %c0_i32_0, %c0_i32_1 : i32, i32, i32
  }
  func.func @transform_7(%arg0: i32) -> (i32, i32, i32) {
    %c0_i32 = arith.constant 0 : i32
    %c0_i32_0 = arith.constant 0 : i32
    %c0_i32_1 = arith.constant 0 : i32
    %c0_i32_2 = arith.constant 0 : i32
    return %c0_i32, %c0_i32_0, %c0_i32_1 : i32, i32, i32
  }
  func.func @transform_8(%arg0: i32) -> (i32, i32) {
    %c0_i32 = arith.constant 0 : i32
    %c0_i32_0 = arith.constant 0 : i32
    %c0_i32_1 = arith.constant 0 : i32
    return %c0_i32, %c0_i32_0 : i32, i32
  }
  func.func @transform_9(%arg0: i32) -> (i32, i32) {
    %c0_i32 = arith.constant 0 : i32
    %c0_i32_0 = arith.constant 0 : i32
    %c0_i32_1 = arith.constant 0 : i32
    return %c0_i32, %c0_i32_0 : i32, i32
  }
  func.func @transform_10(%arg0: i32) -> (i32, i32) {
    %c0_i32 = arith.constant 0 : i32
    %c0_i32_0 = arith.constant 0 : i32
    %c0_i32_1 = arith.constant 0 : i32
    return %c0_i32, %c0_i32_0 : i32, i32
  }
}

</mosaic_0001>

<bundles_post_ra>
// kernel: llama_decoder_layer.1
= control target key start
LH: loop header
LB: loop body
LE: loop exit
PB: predicated region body
PF: predicated region fallthrough
CT: control target
= control target key end

     0   :  { %vm40_vm0 = vcmask 261120   ;;  %s1804_s0 = inlined_call_operand.vmem [shape: f32[16,32], index: 0, kind: input, shape index: {}]   ;;  %s1805_s1 = inlined_call_operand.vmem [shape: f32[16,16], index: 1, kind: input, shape index: {}]   ;;  %s1806_s2 = inlined_call_operand.vmem [shape: f32[16,8], index: 2, kind: input, shape index: {}]   ;;  %s1807_s3 = inlined_call_operand.vmem [shape: f32[16,8], index: 3, kind: input, shape index: {}]   ;;  %s1808_s4 = inlined_call_operand.vmem [shape: f32[1,32], index: 4, kind: input, shape index: {}]   ;;  %s1809_s5 = inlined_call_operand.vmem [shape: f32[1,32], index: 5, kind: input, shape index: {}]   ;;  %s1810_s6 = inlined_call_operand.vmem [shape: f32[4,32,24], index: 6, kind: input, shape index: {}]   ;;  %s1811_s7 = inlined_call_operand.vmem [shape: f32[4,8,32], index: 7, kind: input, shape index: {}]   ;;  %s1812_s8 = inlined_call_operand.vmem [shape: f32[32,128], index: 8, kind: input, shape index: {}]   ;;  %s1813_s9 = inlined_call_operand.vmem [shape: f32[64,32], index: 9, kind: input, shape index: {}]   ;;  %s1814_s10 = inlined_call_operand.hbm [shape: f32[16,32], index: 10, kind: output, shape index: {}]  }
   0x1   :  { %v1367_v0 = vld [vmem:[%s1804_s0 + $0x8] sm:$0xff] }
   0x2   :  { %v39_v1 = vmul.f32 %v1367_v0, %v1367_v0 }
   0x3   :  { %15 = vsyncpa [#allocation3], 0  ;;  %v1374_v2 = vld [vmem:[%s1804_s0] sm:$0xff]  ;;  %v1299_v6 = vmov 32.0   ;;  %v89_v10 = vld [vmem:[%s1810_s6 + $0x18] sm:$0xff]  ;;  %s1301_s30 = smov 124  }
   0x4   :  { %v44_v3 = vsel %vm40_vm0, %v39_v1, 0.0  ;;  %v38_v4 = vmul.f32 %v1374_v2, %v1374_v2  ;;  %1222 = vrcp.f32 %v1299_v6  ;;  %v93_v11 = vld [vmem:[%s1810_s6 + $0x38] sm:$0xff]  ;;  %1182 = vmatpush.msra.mxu2 %v89_v10  ;;  %v88_v12 = vld [vmem:[%s1810_s6 + $0x10] sm:$0xff]  ;;  %120 = vmatpush.msra.mxu0 %v89_v10  ;;  %v87_v15 = vld [vmem:[%s1810_s6 + $0x8] sm:$0xff]  ;;  %s1302_s13 = smov 8   ;;  %vm284_vm8 = vcmask 31744  }
   0x5   :  { %45 = vadd.xlane.f32.xlu0 %v44_v3  ;;  %1186 = vmatpush.msra.mxu3 %v93_v11  ;;  %v92_v13 = vld [vmem:[%s1810_s6 + $0x30] sm:$0xff]  ;;  %v91_v16 = vld [vmem:[%s1810_s6 + $0x28] sm:$0xff]  ;;  %v86_v17 = vld [vmem:[%s1810_s6] sm:$0xff]  ;;  %vm437_vm9 = vcmask 64512   ;;  %vm588_vm10 = vcmask 130048   ;;  %s1124_s14 = sshll.u32 %s1814_s10, 4  ;;  %s1125_s14 = int_to_ptr.hbm [resolvable:$true] %s1124_s14 }
   0x6   :  { %v41_v5 = vsel %vm40_vm0, %v38_v4, 0.0  ;;  %143 = vmatpush.msra.mxu1 %v93_v11  ;;  %1183 = vmatpush.msra.mxu2 %v88_v12  ;;  %v90_v18 = vld [vmem:[%s1810_s6 + $0x20] sm:$0xff]  ;;  %v97_v20 = vld [vmem:[%s1810_s6 + $0x58] sm:$0xff]  ;;  %v96_v22 = vld [vmem:[%s1810_s6 + $0x50] sm:$0xff]  ;;  %s1308_s15 = smov 128  }
   0x7   :  { %1187 = vmatpush.msra.mxu3 %v92_v13  ;;  %121 = vmatpush.msra.mxu0 %v88_v12  ;;  %v101_v21 = vld [vmem:[%s1810_s6 + $0x78] sm:$0xff]  ;;  %v100_v23 = vld [vmem:[%s1810_s6 + $0x70] sm:$0xff]  ;;  %v95_v25 = vld [vmem:[%s1810_s6 + $0x48] sm:$0xff] }
   0x8   :  { %144 = vmatpush.msra.mxu1 %v92_v13  ;;  %1184 = vmatpush.msra.mxu2 %v87_v15  ;;  %v99_v26 = vld [vmem:[%s1810_s6 + $0x68] sm:$0xff]  ;;  %v94_v27 = vld [vmem:[%s1810_s6 + $0x40] sm:$0xff] }
   0x9   :  { %1188 = vmatpush.msra.mxu3 %v91_v16  ;;  %122 = vmatpush.msra.mxu0 %v87_v15  ;;  %v98_v28 = vld [vmem:[%s1810_s6 + $0x60] sm:$0xff] }
   0xa   :  { %v1223_v7 = vpop.eup %1222  ;;  %145 = vmatpush.msra.mxu1 %v91_v16  ;;  %1185 = vmatpush.msra.mxu2 %v86_v17  ;;  %v1220_v43 = vld [vmem:[%s1808_s4] ss:$0 sm:$0xff]  ;;  %s1300_s4 = smov 116  }
   0xb   :  { %v48_v8 = vmul.f32 32.0, %v1223_v7  ;;  %1189 = vmatpush.msra.mxu3 %v90_v18  ;;  %vm52_vm1 = vweird.f32 %v1223_v7  ;;  %123 = vmatpush.msra.mxu0 %v86_v17  ;;  %v1521_v17 = vld [vmem:[%s1807_s3 + $0x8] sm:$0xff] }
   0xc   :  { %146 = vmatpush.msra.mxu1 %v90_v18  ;;  %166 = vmatpush.msrb.mxu2 %v97_v20 }
   0xd   :  { %42 = vadd.xlane.f32.xlu0 %v41_v5  ;;  %v49_v9 = vsub.f32 1.0, %v48_v8  ;;  %189 = vmatpush.msrb.mxu3 %v101_v21  ;;  %v1509_v8 = vld [vmem:[%s1806_s2] sm:$0xff] }
   0xe   :  { %167 = vmatpush.msrb.mxu2 %v96_v22 }
   0xf   :  { %v50_v14 = vmul.f32 %v1223_v7, %v49_v9  ;;  %190 = vmatpush.msrb.mxu3 %v100_v23 }
  0x10   :  { %168 = vmatpush.msrb.mxu2 %v95_v25 }
  0x11   :  { %v51_v19 = vadd.f32 %v1223_v7, %v50_v14  ;;  %191 = vmatpush.msrb.mxu3 %v99_v26  ;;  %v1516_v14 = vld [vmem:[%s1807_s3] sm:$0xff]  ;;  %s1304_s3 = smov 120  }
  0x12   :  { %169 = vmatpush.msrb.mxu2 %v94_v27 }
  0x13   :  { %v1416_v24 = vsel %vm52_vm1, %v1223_v7, %v51_v19  ;;  %192 = vmatpush.msrb.mxu3 %v98_v28  ;;  %v1500_v7 = vld [vmem:[%s1806_s2 + $0x8] sm:$0xff]  ;;  %s1303_s2 = smov 4  }
  0x78   :  { %v46_v29 = vpop.xlane.xlu0 %45 }
  0x79   :  { %v55_v30 = vmul.f32 %v1416_v24, %v46_v29 }
  0x7b   :  { %v57_v31 = vadd.f32 1e-06, %v55_v30 }
  0x7d   :  { %1224 = vrsqrt.f32 %v57_v31  ;;  %vm74_vm3 = vweird.f32 %v57_v31 }
  0x80   :  { %v43_v32 = vpop.xlane.xlu0 %42 }
  0x81   :  { %v54_v33 = vmul.f32 %v1416_v24, %v43_v32 }
  0x83   :  { %v1225_v34 = vpop.eup %1224  ;;  %v56_v35 = vadd.f32 1e-06, %v54_v33 }
  0x84   :  { %v69_v36 = vmul.f32 %v1225_v34, %v57_v31  ;;  %vm75_vm2 = vweird.f32 %v1225_v34 }
  0x85   :  { %1226 = vrsqrt.f32 %v56_v35  ;;  %vm76_vm4 = vmor %vm74_vm3, %vm75_vm2  ;;  %vm64_vm6 = vweird.f32 %v56_v35 }
  0x86   :  { %v70_v37 = vmul.f32 %v1225_v34, %v69_v36 }
  0x88   :  { %v71_v38 = vmul.f32 0.5, %v70_v37 }
  0x8a   :  { %v72_v39 = vsub.f32 1.5, %v71_v38 }
  0x8b   :  { %v1227_v40 = vpop.eup %1226 }
  0x8c   :  { %v73_v41 = vmul.f32 %v1225_v34, %v72_v39  ;;  %v59_v42 = vmul.f32 %v1227_v40, %v56_v35  ;;  %vm65_vm5 = vweird.f32 %v1227_v40 }
  0x8d   :  { %vm66_vm7 = vmor %vm64_vm6, %vm65_vm5  ;;  %vm1084_vm6 = vcmask 523264  }
  0x8e   :  { %v77_v44 = vsel %vm76_vm4, %v1225_v34, %v73_v41  ;;  %v60_v45 = vmul.f32 %v1227_v40, %v59_v42 }
  0x8f   :  { %v79_v46 = vmul.f32 %v77_v44, %v1367_v0 }
  0x90   :  { %v61_v47 = vmul.f32 0.5, %v60_v45 }
  0x91   :  { %v85_v48 = vmul.f32 %v1220_v43, %v79_v46 }
  0x92   :  { %v62_v49 = vsub.f32 1.5, %v61_v47 }
  0x93   :  { %1137 = vmatmul.msk.f32.vlgmr.msra.gmra.mxu2 %vm40_vm0, %v85_v48  ;;  %1139 = vmatmul.msk.f32.vlgmr.msra.gmra.mxu3 %vm40_vm0, %v85_v48 }
  0x94   :  { %v63_v50 = vmul.f32 %v1227_v40, %v62_v49 }
  0x96   :  { %v67_v51 = vsel %vm66_vm7, %v1227_v40, %v63_v50 }
  0x97   :  { %v78_v52 = vmul.f32 %v67_v51, %v1374_v2 }
  0x99   :  { %v84_v53 = vmul.f32 %v1220_v43, %v78_v52 }
  0x9b   :  { %1136 = vmatmul.msk.f32.vlgmr.msra.gmra.mxu0 %vm40_vm0, %v84_v53  ;;  %1138 = vmatmul.msk.f32.vlgmr.msra.gmra.mxu1 %vm40_vm0, %v84_v53 }
  0x9c   :  { %1140 = vmatmul.msk.f32.vlgmr.msrb.gmra.mxu2 %vm40_vm0, %v84_v53  ;;  %1142 = vmatmul.msk.f32.vlgmr.msrb.gmra.mxu3 %vm40_vm0, %v84_v53 }
  0xa4   :  { %1141 = vmatmul.msk.f32.gmra.mxu2 %vm40_vm0, %v85_v48  ;;  %1143 = vmatmul.msk.f32.gmra.mxu3 %vm40_vm0, %v85_v48 }
 0x116   :  { %v1445_v54 = vpop.f32.mrf.mxu2  ;;  %v1447_v55 = vpop.f32.mrf.mxu3 }
 0x117   :  { %v213_v56 = vsub.f32 0.0, %v1445_v54  ;;  %v215_v4 = vsub.f32 0.0, %v1447_v55 }
 0x118   :  { %v1477_v0 = vpop.f32.mrf.mxu0  ;;  %v1488_v3 = vpop.f32.mrf.mxu1 }
 0x119   :  { %327 = vrot.lane.b32.xlu2 %v213_v56, %s1300_s4  ;;  %v214_v5 = vsub.f32 0.0, %v1488_v3  ;;  %v212_v6 = vsub.f32 0.0, %v1477_v0 }
 0x11f   :  { %v1452_v57 = vpop.f32.mrf.mxu2  ;;  %v1454_v58 = vpop.f32.mrf.mxu3 }
 0x120   :  { %357 = vrot.lane.b32.xlu1 %v1452_v57, %s1301_s30  ;;  %v218_v59 = vsub.f32 0.0, %v1454_v58  ;;  %v216_v60 = vsub.f32 0.0, %v1452_v57 }
 0x122   :  { %337 = vrot.lane.b32.xlu2 %v218_v59, %s1300_s4  ;;  %333 = vrot.lane.b32.xlu0 %v216_v60, %s1300_s4 }
 0x127   :  { %v1466_v61 = vpop.f32.mrf.mxu3  ;;  %v1472_v62 = vpop.f32.mrf.mxu2 }
 0x128   :  { %361 = vrot.lane.b32.xlu1 %v1454_v58, %s1301_s30  ;;  %v219_v63 = vsub.f32 0.0, %v1466_v61  ;;  %v217_v1 = vsub.f32 0.0, %v1472_v62 }
 0x12a   :  { %363 = vrot.lane.b32.xlu2 %v1466_v61, %s1301_s30  ;;  %355 = vrot.lane.b32.xlu0 %v1447_v55, %s1301_s30 }
 0x130   :  { %359 = vrot.lane.b32.xlu1 %v1472_v62, %s1301_s30 }
 0x132   :  { %339 = vrot.lane.b32.xlu2 %v219_v63, %s1300_s4  ;;  %349 = vrot.lane.b32.xlu0 %v1477_v0, %s1301_s30 }
 0x138   :  { %335 = vrot.lane.b32.xlu1 %v217_v1, %s1300_s4 }
 0x13a   :  { %351 = vrot.lane.b32.xlu2 %v1445_v54, %s1301_s30 }
 0x140   :  { %331 = vrot.lane.b32.xlu1 %v215_v4, %s1300_s4 }
 0x142   :  { %329 = vrot.lane.b32.xlu2 %v214_v5, %s1300_s4 }
 0x148   :  { %325 = vrot.lane.b32.xlu1 %v212_v6, %s1300_s4 }
 0x14a   :  { %313 = vrot.lane.b32.xlu2 %v1500_v7, %s1302_s13 }
 0x150   :  { %353 = vrot.lane.b32.xlu1 %v1488_v3, %s1301_s30 }
 0x158   :  { %311 = vrot.lane.b32.xlu1 %v1509_v8, %s1302_s13 }
 0x173   :  { %v328_v9 = vpop.permute.xlu2 %327 }
 0x17c   :  { %v338_v10 = vpop.permute.xlu2 %337 }
 0x184   :  { %v364_v11 = vpop.permute.xlu2 %363 }
 0x18c   :  { %v340_v12 = vpop.permute.xlu2 %339 }
 0x18d   :  { %v380_v23 = vsel %vm284_vm8, %v340_v12, %v364_v11 }
 0x18e   :  { %v388_v27 = vmul.f32 %v380_v23, %v1521_v17 }
 0x192   :  { %v358_v13 = vpop.permute.xlu1 %357 }
 0x194   :  { %v352_v15 = vpop.permute.xlu2 %351  ;;  %v334_v16 = vpop.permute.xlu0 %333 }
 0x195   :  { %v374_v18 = vsel %vm284_vm8, %v328_v9, %v352_v15  ;;  %v377_v19 = vsel %vm284_vm8, %v334_v16, %v358_v13 }
 0x196   :  { %v382_v20 = vmul.f32 %v374_v18, %v1521_v17  ;;  %v385_v21 = vmul.f32 %v377_v19, %v1516_v14 }
 0x198   :  { %399 = vrot.lane.b32.xlu2 %v382_v20, %s1302_s13  ;;  %405 = vrot.lane.b32.xlu0 %v385_v21, %s1302_s13 }
 0x19a   :  { %v362_v22 = vpop.permute.xlu1 %361 }
 0x19b   :  { %v379_v25 = vsel %vm284_vm8, %v338_v10, %v362_v22 }
 0x19c   :  { %v387_v26 = vmul.f32 %v379_v25, %v1516_v14  ;;  %v356_v32 = vpop.permute.xlu0 %355  ;;  %v330_v40 = vpop.permute.xlu2 %329 }
 0x19e   :  { %409 = vrot.lane.b32.xlu1 %v387_v26, %s1302_s13  ;;  %v209_v26 = vmul.f32 %v1500_v7, %v1472_v62 }
 0x1a0   :  { %411 = vrot.lane.b32.xlu2 %v388_v27, %s1302_s13 }
 0x1a2   :  { %v360_v28 = vpop.permute.xlu1 %359 }
 0x1a4   :  { %v350_v36 = vpop.permute.xlu0 %349  ;;  %v314_v44 = vpop.permute.xlu2 %313 }
 0x1a5   :  { %v318_v45 = vmul.f32 %v314_v44, %v1445_v54  ;;  %v322_v53 = vmul.f32 %v314_v44, %v1472_v62 }
 0x1aa   :  { %v336_v29 = vpop.permute.xlu1 %335 }
 0x1ab   :  { %v378_v30 = vsel %vm284_vm8, %v336_v29, %v360_v28 }
 0x1ac   :  { %v386_v31 = vmul.f32 %v378_v30, %v1521_v17 }
 0x1ae   :  { %407 = vrot.lane.b32.xlu0 %v386_v31, %s1302_s13 }
 0x1b2   :  { %v332_v33 = vpop.permute.xlu1 %331 }
 0x1b3   :  { %v376_v34 = vsel %vm284_vm8, %v332_v33, %v356_v32 }
 0x1b4   :  { %v384_v35 = vmul.f32 %v376_v34, %v1521_v17 }
 0x1b6   :  { %403 = vrot.lane.b32.xlu0 %v384_v35, %s1302_s13 }
 0x1ba   :  { %v326_v37 = vpop.permute.xlu1 %325 }
 0x1bb   :  { %v373_v38 = vsel %vm284_vm8, %v326_v37, %v350_v36 }
 0x1bc   :  { %v381_v39 = vmul.f32 %v373_v38, %v1516_v14  ;;  %v208_v38 = vmul.f32 %v1509_v8, %v1452_v57 }
 0x1be   :  { %270 = vrot.lane.b32.xlu0 %v1472_v62, %s1303_s2  ;;  %397 = vrot.lane.b32.xlu1 %v381_v39, %s1302_s13 }
 0x1c2   :  { %v354_v41 = vpop.permute.xlu1 %353 }
 0x1c3   :  { %v375_v42 = vsel %vm284_vm8, %v330_v40, %v354_v41 }
 0x1c4   :  { %v383_v43 = vmul.f32 %v375_v42, %v1516_v14 }
 0x1c6   :  { %236 = vrot.lane.b32.xlu1 %v216_v60, %s1301_s30  ;;  %401 = vrot.lane.b32.xlu2 %v383_v43, %s1302_s13 }
 0x1ca   :  { %v312_v48 = vpop.permute.xlu1 %311 }
 0x1cb   :  { %v321_v49 = vmul.f32 %v312_v48, %v1452_v57  ;;  %v323_v13 = vmul.f32 %v312_v48, %v1454_v58  ;;  %v317_v19 = vmul.f32 %v312_v48, %v1477_v0  ;;  %v319_v27 = vmul.f32 %v312_v48, %v1488_v3 }
 0x1ce   :  { %240 = vrot.lane.b32.xlu1 %v218_v59, %s1301_s30  ;;  %268 = vrot.lane.b32.xlu2 %v1452_v57, %s1303_s2 }
 0x1d6   :  { %242 = vrot.lane.b32.xlu1 %v219_v63, %s1301_s30  ;;  %272 = vrot.lane.b32.xlu2 %v1454_v58, %s1303_s2 }
 0x1de   :  { %238 = vrot.lane.b32.xlu2 %v217_v1, %s1301_s30  ;;  %v320_v1 = vmul.f32 %v314_v44, %v1447_v55 }
 0x1e6   :  { %274 = vrot.lane.b32.xlu2 %v1466_v61, %s1303_s2 }
 0x1ee   :  { %228 = vrot.lane.b32.xlu2 %v212_v6, %s1301_s30 }
 0x1f2   :  { %v400_v46 = vpop.permute.xlu2 %399 }
 0x1f3   :  { %v422_v47 = vadd.f32 %v400_v46, %v318_v45  ;;  %v210_v45 = vmul.f32 %v1509_v8, %v1454_v58 }
 0x1f5   :  { %435 = vrot.lane.b32.xlu0 %v422_v47, %s1304_s3 }
 0x1f6   :  { %264 = vrot.lane.b32.xlu2 %v1488_v3, %s1303_s2 }
 0x1fa   :  { %v412_v52 = vpop.permute.xlu2 %411 }
 0x1fe   :  { %230 = vrot.lane.b32.xlu2 %v213_v56, %s1301_s30  ;;  %v324_v56 = vmul.f32 %v314_v44, %v1466_v61 }
 0x200   :  { %v428_v10 = vadd.f32 %v412_v52, %v324_v56 }
 0x206   :  { %266 = vrot.lane.b32.xlu2 %v1447_v55, %s1303_s2 }
 0x20a   :  { %v406_v50 = vpop.permute.xlu0 %405 }
 0x20b   :  { %v425_v51 = vadd.f32 %v406_v50, %v321_v49 }
 0x20d   :  { %512 = vrot.lane.b32.xlu0 %v425_v51, %s1304_s3 }
 0x210   :  { %v410_v12 = vpop.permute.xlu1 %409 }
 0x211   :  { %v427_v16 = vadd.f32 %v410_v12, %v323_v13 }
 0x220   :  { %v408_v59 = vpop.permute.xlu0 %407  ;;  %v402_v60 = vpop.permute.xlu2 %401 }
 0x221   :  { %v426_v63 = vadd.f32 %v408_v59, %v322_v53  ;;  %v423_v28 = vadd.f32 %v402_v60, %v319_v27  ;;  %v211_v59 = vmul.f32 %v1500_v7, %v1466_v61 }
 0x223   :  { %514 = vrot.lane.b32.xlu0 %v426_v63, %s1304_s3  ;;  %v204_v63 = vmul.f32 %v1509_v8, %v1477_v0 }
 0x228   :  { %v404_v6 = vpop.permute.xlu0 %403  ;;  %v269_v9 = vpop.permute.xlu2 %268 }
 0x229   :  { %v424_v11 = vadd.f32 %v404_v6, %v320_v1 }
 0x22b   :  { %475 = vrot.lane.b32.xlu1 %v424_v11, %s1304_s3  ;;  %553 = vrot.lane.b32.xlu0 %v428_v10, %s1304_s3  ;;  %v206_v11 = vmul.f32 %v1509_v8, %v1488_v3 }
 0x230   :  { %v273_v15 = vpop.permute.xlu2 %272  ;;  %v398_v18 = vpop.permute.xlu1 %397 }
 0x231   :  { %v271_v20 = vpop.permute.xlu0 %270  ;;  %v421_v22 = vadd.f32 %v398_v18, %v317_v19 }
 0x233   :  { %232 = vrot.lane.b32.xlu0 %v214_v5, %s1301_s30  ;;  %551 = vrot.lane.b32.xlu1 %v427_v16, %s1304_s3 }
 0x238   :  { %v239_v21 = vpop.permute.xlu2 %238  ;;  %v237_v30 = vpop.permute.xlu1 %236 }
 0x239   :  { %v290_v23 = vsel %vm284_vm8, %v239_v21, %v271_v20  ;;  %v289_v34 = vsel %vm284_vm8, %v237_v30, %v269_v9 }
 0x23a   :  { %v298_v25 = vmul.f32 %v290_v23, %v1521_v17  ;;  %v297_v37 = vmul.f32 %v289_v34, %v1516_v14  ;;  %v205_v23 = vmul.f32 %v1500_v7, %v1445_v54 }
 0x23b   :  { %260 = vrot.lane.b32.xlu1 %v1477_v0, %s1303_s2  ;;  %433 = vrot.lane.b32.xlu0 %v421_v22, %s1304_s3 }
 0x23c   :  { %v306_v5 = vadd.f32 %v298_v25, %v209_v26  ;;  %v305_v39 = vadd.f32 %v297_v37, %v208_v38  ;;  %v429_v26 = vld [vmem:[%s1805_s1] sm:$0xff] }
 0x240   :  { %v241_v31 = vpop.permute.xlu1 %240  ;;  %v275_v33 = vpop.permute.xlu2 %274 }
 0x241   :  { %v291_v42 = vsel %vm284_vm8, %v241_v31, %v273_v15 }
 0x242   :  { %v299_v44 = vmul.f32 %v291_v42, %v1516_v14 }
 0x243   :  { %473 = vrot.lane.b32.xlu1 %v423_v28, %s1304_s3  ;;  %234 = vrot.lane.b32.xlu0 %v215_v4, %s1301_s30 }
 0x244   :  { %v307_v48 = vadd.f32 %v299_v44, %v210_v45 }
 0x248   :  { %v243_v35 = vpop.permute.xlu1 %242  ;;  %v229_v4 = vpop.permute.xlu2 %228 }
 0x249   :  { %v292_v49 = vsel %vm284_vm8, %v243_v35, %v275_v33 }
 0x24a   :  { %v300_v50 = vmul.f32 %v292_v49, %v1521_v17  ;;  %v1200_v49 = vpack.i.bf16 %v1452_v57, %v1472_v62 }
 0x24b   :  { %262 = vrot.lane.b32.xlu1 %v1445_v54, %s1303_s2 }
 0x24c   :  { %v308_v1 = vadd.f32 %v300_v50, %v211_v59 }
 0x250   :  { %v265_v43 = vpop.permute.xlu2 %264 }
 0x258   :  { %v231_v51 = vpop.permute.xlu2 %230 }
 0x260   :  { %v267_v15 = vpop.permute.xlu2 %266 }
 0x267   :  { %v436_v29 = vpop.permute.xlu0 %435 }
 0x268   :  { %1144 = vmatpush.xpose.msk.msrb.mxu0 %vm437_vm9, %v436_v29 }
 0x27f   :  { %v513_v32 = vpop.permute.xlu0 %512 }
 0x295   :  { %v515_v36 = vpop.permute.xlu0 %514 }
 0x296   :  { %1152 = vmatpush.xpose.msk.msra.mxu2 %vm437_vm9, %v515_v36 }
 0x29a   :  { %1153 = vmatpush.xpose.msk.msra.mxu2 %vm437_vm9, %v513_v32 }
 0x29d   :  { %v554_v40 = vpop.permute.xlu0 %553  ;;  %1154 = vmatmul.msk.f32.vlgmr.msra.gmra.mxu2 %vm437_vm9, %v305_v39  ;;  %v476_v41 = vpop.permute.xlu1 %475 }
 0x29e   :  { %1148 = vmatpush.xpose.msk.msrb.mxu1 %vm437_vm9, %v476_v41  ;;  %1156 = vmatpush.xpose.msk.msra.mxu3 %vm437_vm9, %v554_v40 }
 0x2a5   :  { %v233_v46 = vpop.permute.xlu0 %232  ;;  %1155 = vmatmul.msk.f32.gmra.mxu2 %vm437_vm9, %v306_v5  ;;  %v552_v47 = vpop.permute.xlu1 %551 }
 0x2a6   :  { %1157 = vmatpush.xpose.msk.msra.mxu3 %vm437_vm9, %v552_v47  ;;  %v287_v6 = vsel %vm284_vm8, %v233_v46, %v265_v43 }
 0x2a7   :  { %v295_v10 = vmul.f32 %v287_v6, %v1516_v14 }
 0x2a9   :  { %1158 = vmatmul.msk.f32.vlgmr.msra.gmra.mxu3 %vm437_vm9, %v307_v48  ;;  %v303_v16 = vadd.f32 %v295_v10, %v206_v11  ;;  %v1205_v48 = vpack.i.bf16 %v1454_v58, %v1466_v61 }
 0x2ad   :  { %v434_v52 = vpop.permute.xlu0 %433  ;;  %v261_v53 = vpop.permute.xlu1 %260 }
 0x2ae   :  { %v285_v60 = vsel %vm284_vm8, %v229_v4, %v261_v53  ;;  %1145 = vmatpush.xpose.msk.msrb.mxu0 %vm437_vm9, %v434_v52 }
 0x2af   :  { %v293_v56 = vmul.f32 %v285_v60, %v1516_v14  ;;  %v207_v14 = vmul.f32 %v1500_v7, %v1447_v55  ;;  %v430_v7 = vld [vmem:[%s1805_s1 + $0x8] sm:$0xff]  ;;  %s1305_s1 = smov 112  }
 0x2b1   :  { %v301_v9 = vadd.f32 %v293_v56, %v204_v63  ;;  %1159 = vmatmul.msk.f32.gmra.mxu3 %vm437_vm9, %v308_v1 }
 0x2b3   :  { %1146 = vmatmul.msk.f32.vlgmr.msrb.gmra.mxu0 %vm437_vm9, %v301_v9 }
 0x2b5   :  { %v235_v12 = vpop.permute.xlu0 %234  ;;  %v474_v13 = vpop.permute.xlu1 %473 }
 0x2b6   :  { %1149 = vmatpush.xpose.msk.msrb.mxu1 %vm437_vm9, %v474_v13  ;;  %v288_v18 = vsel %vm284_vm8, %v235_v12, %v267_v15 }
 0x2b7   :  { %v296_v19 = vmul.f32 %v288_v18, %v1521_v17 }
 0x2b9   :  { %1150 = vmatmul.msk.f32.vlgmr.msrb.gmra.mxu1 %vm437_vm9, %v303_v16  ;;  %v304_v22 = vadd.f32 %v296_v19, %v207_v14 }
 0x2bd   :  { %v263_v20 = vpop.permute.xlu1 %262 }
 0x2be   :  { %v286_v21 = vsel %vm284_vm8, %v231_v51, %v263_v20 }
 0x2bf   :  { %v294_v8 = vmul.f32 %v286_v21, %v1521_v17 }
 0x2c1   :  { %1151 = vmatmul.msk.f32.gmra.mxu1 %vm437_vm9, %v304_v22  ;;  %v302_v25 = vadd.f32 %v294_v8, %v205_v23  ;;  %v1210_v22 = vpack.i.bf16 %v1447_v55, %v1445_v54 }
 0x2c3   :  { %1147 = vmatmul.msk.f32.gmra.mxu0 %vm437_vm9, %v302_v25 }
 0x320   :  { %v543_v36 = vpop.f32.mrf.mxu2 }
 0x321   :  { %v544_v45 = vadd.f32 %v543_v36, %v429_v26 }
 0x323   :  { %v601_v47 = vsel %vm588_vm10, %v544_v45, -inf }
 0x328   :  { %v546_v42 = vpop.f32.mrf.mxu2 }
 0x329   :  { %v547_v44 = vadd.f32 %v546_v42, %v430_v7 }
 0x32b   :  { %v604_v46 = vsel %vm588_vm10, %v547_v44, -inf }
 0x32c   :  { %v582_v5 = vpop.f32.mrf.mxu3 }
 0x32d   :  { %v583_v27 = vadd.f32 %v582_v5, %v429_v26 }
 0x32f   :  { %v607_v28 = vsel %vm588_vm10, %v583_v27, -inf }
 0x330   :  { %608 = vmax.xlane.f32.xlu1 %v607_v28  ;;  %v465_v17 = vpop.f32.mrf.mxu0 }
 0x331   :  { %v466_v29 = vadd.f32 %v465_v17, %v429_v26 }
 0x333   :  { %v589_v30 = vsel %vm588_vm10, %v466_v29, -inf }
 0x334   :  { %v585_v31 = vpop.f32.mrf.mxu3  ;;  %590 = vmax.xlane.f32.xlu0 %v589_v30 }
 0x335   :  { %v586_v32 = vadd.f32 %v585_v31, %v430_v7 }
 0x336   :  { %v504_v33 = vpop.f32.mrf.mxu1 }
 0x337   :  { %v505_v34 = vadd.f32 %v504_v33, %v429_v26  ;;  %v610_v35 = vsel %vm588_vm10, %v586_v32, -inf }
 0x338   :  { %611 = vmax.xlane.f32.xlu1 %v610_v35 }
 0x339   :  { %v595_v37 = vsel %vm588_vm10, %v505_v34, -inf }
 0x33a   :  { %596 = vmax.xlane.f32.xlu2 %v595_v37 }
 0x33e   :  { %v507_v4 = vpop.f32.mrf.mxu1 }
 0x33f   :  { %v1659_v38 = vadd.f32 %v507_v4, %v430_v7  ;;  %v1215_v4 = vpack.i.bf16 %v1488_v3, %v1477_v0 }
 0x340   :  { %v468_v39 = vpop.f32.mrf.mxu0 }
 0x341   :  { %v1661_v40 = vadd.f32 %v468_v39, %v430_v7  ;;  %v598_v41 = vsel %vm588_vm10, %v1659_v38, -inf }
 0x342   :  { %599 = vmax.xlane.f32.xlu2 %v598_v41 }
 0x343   :  { %v592_v43 = vsel %vm588_vm10, %v1661_v40, -inf }
 0x344   :  { %593 = vmax.xlane.f32.xlu0 %v592_v43 }
 0x34a   :  { %605 = vmax.xlane.f32.xlu2 %v604_v46 }
 0x34c   :  { %602 = vmax.xlane.f32.xlu0 %v601_v47 }
 0x360   :  { %1206 = vrot.lane.b32.xlu0 %v1205_v48, %s1305_s1 }
 0x362   :  { %1201 = vrot.lane.b32.xlu2 %v1200_v49, %s1305_s1 }
 0x3a3   :  { %v609_v50 = vpop.xlane.xlu1 %608 }
 0x3a4   :  { %v619_v51 = vsub.f32 %v583_v27, %v609_v50 }
 0x3a6   :  { %v633_v52 = vmul.f32 1.442695, %v619_v51 }
 0x3a7   :  { %v591_v53 = vpop.xlane.xlu0 %590 }
 0x3a8   :  { %1228 = vpow2.f32 %v633_v52  ;;  %v613_v59 = vsub.f32 %v466_v29, %v591_v53 }
 0x3aa   :  { %v621_v60 = vmul.f32 1.442695, %v613_v59 }
 0x3ab   :  { %v612_v63 = vpop.xlane.xlu1 %611 }
 0x3ac   :  { %1230 = vpow2.f32 %v621_v60  ;;  %v620_v56 = vsub.f32 %v586_v32, %v612_v63 }
 0x3ad   :  { %v597_v1 = vpop.xlane.xlu2 %596 }
 0x3ae   :  { %v1229_v58 = vpop.eup %1228  ;;  %v635_v61 = vmul.f32 1.442695, %v620_v56  ;;  %v615_v6 = vsub.f32 %v505_v34, %v597_v1 }
 0x3af   :  { %v655_v9 = vsel %vm588_vm10, %v1229_v58, 0.0 }
 0x3b0   :  { %1232 = vpow2.f32 %v635_v61  ;;  %v625_v57 = vmul.f32 1.442695, %v615_v6  ;;  %656 = vadd.xlane.f32.xlu0 %v655_v9 }
 0x3b2   :  { %v1676_v62 = vpop.eup %1230  ;;  %1234 = vpow2.f32 %v625_v57 }
 0x3b3   :  { %v637_v10 = vsel %vm588_vm10, %v1676_v62, 0.0 }
 0x3b4   :  { %638 = vadd.xlane.f32.xlu1 %v637_v10 }
 0x3b5   :  { %v600_v11 = vpop.xlane.xlu2 %599 }
 0x3b6   :  { %v1233_v12 = vpop.eup %1232  ;;  %v616_v34 = vsub.f32 %v1659_v38, %v600_v11 }
 0x3b7   :  { %v594_v13 = vpop.xlane.xlu0 %593  ;;  %v658_v15 = vsel %vm588_vm10, %v1233_v12, 0.0 }
 0x3b8   :  { %v1681_v16 = vpop.eup %1234  ;;  %659 = vadd.xlane.f32.xlu2 %v658_v15  ;;  %v614_v28 = vsub.f32 %v1661_v40, %v594_v13  ;;  %v627_v35 = vmul.f32 1.442695, %v616_v34  ;;  %v817_v15 = vld [vmem:[%s1811_s7] sm:$0xff] }
 0x3b9   :  { %v643_v18 = vsel %vm588_vm10, %v1681_v16, 0.0 }
 0x3ba   :  { %v623_v29 = vmul.f32 1.442695, %v614_v28 }
 0x3bc   :  { %644 = vadd.xlane.f32.xlu1 %v643_v18 }
 0x3bd   :  { %v606_v19 = vpop.xlane.xlu2 %605 }
 0x3be   :  { %v618_v21 = vsub.f32 %v547_v44, %v606_v19 }
 0x3bf   :  { %v603_v20 = vpop.xlane.xlu0 %602 }
 0x3c0   :  { %v617_v14 = vsub.f32 %v544_v45, %v603_v20  ;;  %v631_v25 = vmul.f32 1.442695, %v618_v21 }
 0x3c2   :  { %v629_v8 = vmul.f32 1.442695, %v617_v14 }
 0x3c4   :  { %1236 = vpow2.f32 %v629_v8  ;;  %1211 = vrot.lane.b32.xlu0 %v1210_v22, %s1305_s1 }
 0x3c5   :  { %v1202_v23 = vpop.permute.xlu2 %1201  ;;  %1238 = vpow2.f32 %v631_v25 }
 0x3c6   :  { %v1203_v26 = vunpack.i.l.bf16 %v1202_v23  ;;  %v1204_v5 = vunpack.i.h.bf16 %v1202_v23  ;;  %1240 = vpow2.f32 %v623_v29 }
 0x3c7   :  { %1242 = vpow2.f32 %v627_v35 }
 0x3c8   :  { %773 = vmatpush.msrb.mxu2 %v1203_v26 }
 0x3ca   :  { %v1237_v27 = vpop.eup %1236  ;;  %774 = vmatpush.msrb.mxu2 %v1204_v5 }
 0x3cb   :  { %v649_v17 = vsel %vm588_vm10, %v1237_v27, 0.0  ;;  %v1239_v30 = vpop.eup %1238 }
 0x3cc   :  { %650 = vadd.xlane.f32.xlu1 %v649_v17  ;;  %v652_v7 = vsel %vm588_vm10, %v1239_v30, 0.0  ;;  %v1241_v32 = vpop.eup %1240 }
 0x3cd   :  { %v640_v33 = vsel %vm588_vm10, %v1241_v32, 0.0  ;;  %v1243_v36 = vpop.eup %1242 }
 0x3ce   :  { %v646_v37 = vsel %vm588_vm10, %v1243_v36, 0.0 }
 0x3d2   :  { %v1207_v54 = vpop.permute.xlu0 %1206 }
 0x3d3   :  { %v1208_v55 = vunpack.i.l.bf16 %v1207_v54  ;;  %v1209_v31 = vunpack.i.h.bf16 %v1207_v54 }
 0x3d4   :  { %653 = vadd.xlane.f32.xlu1 %v652_v7 }
 0x3d5   :  { %808 = vmatpush.msrb.mxu3 %v1208_v55 }
 0x3d7   :  { %809 = vmatpush.msrb.mxu3 %v1209_v31 }
 0x3dc   :  { %641 = vadd.xlane.f32.xlu1 %v640_v33 }
 0x3ee   :  { %647 = vadd.xlane.f32.xlu0 %v646_v37 }
 0x3f5   :  { %1216 = vrot.lane.b32.xlu1 %v1215_v4, %s1305_s1 }
 0x423   :  { %v657_v39 = vpop.xlane.xlu0 %656 }
 0x424   :  { %1244 = vrcp.f32 %v657_v39 }
 0x427   :  { %v639_v43 = vpop.xlane.xlu1 %638 }
 0x42a   :  { %v1245_v40 = vpop.eup %1244 }
 0x42b   :  { %v675_v41 = vmul.f32 %v1245_v40, %v1229_v58  ;;  %v660_v42 = vpop.xlane.xlu2 %659 }
 0x42c   :  { %1246 = vrcp.f32 %v660_v42 }
 0x42d   :  { %1166 = vmatmul.msk.f32.vlgmr.msrb.gmra.mxu3 %vm588_vm10, %v675_v41 }
 0x42f   :  { %v645_v46 = vpop.xlane.xlu1 %644 }
 0x432   :  { %v1247_v38 = vpop.eup %1246 }
 0x433   :  { %v676_v44 = vmul.f32 %v1247_v38, %v1233_v12  ;;  %v819_v12 = vld [vmem:[%s1811_s7 + $0x10] sm:$0xff] }
 0x434   :  { %900 = vmatpush.msra.mxu2 %v819_v12 }
 0x435   :  { %1167 = vmatmul.msk.f32.gmra.mxu3 %vm588_vm10, %v676_v44 }
 0x436   :  { %v1212_v45 = vpop.permute.xlu0 %1211 }
 0x437   :  { %v1214_v47 = vunpack.i.h.bf16 %v1212_v45  ;;  %v1213_v48 = vunpack.i.l.bf16 %v1212_v45 }
 0x439   :  { %703 = vmatpush.msra.mxu0 %v1213_v48  ;;  %738 = vmatpush.msra.mxu1 %v1214_v47  ;;  %v995_v47 = vld [vmem:[%s1812_s8 + $0x10] sm:$0xff]  ;;  %v994_v48 = vld [vmem:[%s1812_s8 + $0x8] sm:$0xff] }
 0x43f   :  { %v651_v0 = vpop.xlane.xlu1 %650 }
 0x440   :  { %1248 = vrcp.f32 %v651_v0  ;;  %v993_v0 = vld [vmem:[%s1812_s8] sm:$0xff] }
 0x446   :  { %v1249_v3 = vpop.eup %1248 }
 0x447   :  { %v673_v49 = vmul.f32 %v1249_v3, %v1237_v27  ;;  %v654_v50 = vpop.xlane.xlu1 %653 }
 0x448   :  { %1250 = vrcp.f32 %v654_v50 }
 0x449   :  { %1164 = vmatmul.msk.f32.vlgmr.msrb.gmra.mxu2 %vm588_vm10, %v673_v49  ;;  %1252 = vrcp.f32 %v639_v43 }
 0x44a   :  { %1254 = vrcp.f32 %v645_v46  ;;  %v996_v46 = vld [vmem:[%s1812_s8 + $0x18] sm:$0xff] }
 0x44e   :  { %v1251_v51 = vpop.eup %1250 }
 0x44f   :  { %v674_v52 = vmul.f32 %v1251_v51, %v1239_v30  ;;  %v642_v53 = vpop.xlane.xlu1 %641  ;;  %v1253_v59 = vpop.eup %1252 }
 0x450   :  { %v1255_v63 = vpop.eup %1254  ;;  %1256 = vrcp.f32 %v642_v53  ;;  %v669_v61 = vmul.f32 %v1253_v59, %v1676_v62  ;;  %v820_v62 = vld [vmem:[%s1811_s7 + $0x18] sm:$0xff] }
 0x451   :  { %1165 = vmatmul.msk.f32.gmra.mxu2 %vm588_vm10, %v674_v52  ;;  %v671_v6 = vmul.f32 %v1255_v63, %v1681_v16  ;;  %929 = vmatpush.msra.mxu3 %v820_v62  ;;  %v818_v16 = vld [vmem:[%s1811_s7 + $0x8] sm:$0xff] }
 0x456   :  { %v1257_v9 = vpop.eup %1256 }
 0x457   :  { %v670_v10 = vmul.f32 %v1257_v9, %v1241_v32  ;;  %v1221_v9 = vld [vmem:[%s1809_s5] ss:$0 sm:$0xff]  ;;  %s1306_s5 = smov 64  }
 0x461   :  { %v648_v60 = vpop.xlane.xlu0 %647 }
 0x462   :  { %1258 = vrcp.f32 %v648_v60 }
 0x467   :  { %v1217_v56 = vpop.permute.xlu1 %1216 }
 0x468   :  { %v1219_v1 = vunpack.i.h.bf16 %v1217_v56  ;;  %v1218_v58 = vunpack.i.l.bf16 %v1217_v56  ;;  %v1259_v57 = vpop.eup %1258 }
 0x469   :  { %v672_v11 = vmul.f32 %v1259_v57, %v1243_v36 }
 0x46a   :  { %704 = vmatpush.msra.mxu0 %v1218_v58  ;;  %739 = vmatpush.msra.mxu1 %v1219_v1 }
 0x46b   :  { %1160 = vmatmul.msk.f32.vlgmr.msra.gmra.mxu0 %vm588_vm10, %v669_v61  ;;  %1162 = vmatmul.msk.f32.vlgmr.msra.gmra.mxu1 %vm588_vm10, %v671_v6 }
 0x46c   :  { %842 = vmatpush.msrb.mxu0 %v817_v15  ;;  %871 = vmatpush.msrb.mxu1 %v818_v16 }
 0x46e   :  { %1015 = vmatpush.msra.mxu0 %v996_v46 }
 0x470   :  { %1016 = vmatpush.msra.mxu0 %v995_v47 }
 0x472   :  { %1017 = vmatpush.msra.mxu0 %v994_v48 }
 0x473   :  { %1161 = vmatmul.msk.f32.gmra.mxu0 %vm588_vm10, %v670_v10  ;;  %1163 = vmatmul.msk.f32.gmra.mxu1 %vm588_vm10, %v672_v11 }
 0x474   :  { %1018 = vmatpush.msra.mxu0 %v993_v0 }
 0x4b0   :  { %v811_v13 = vpop.f32.mrf.mxu3 }
 0x4b1   :  { %1174 = vmatmul.msk.f32.vlgmr.msra.gmra.mxu3 %vm437_vm9, %v811_v13 }
 0x4b8   :  { %v814_v18 = vpop.f32.mrf.mxu3 }
 0x4b9   :  { %1175 = vmatmul.msk.f32.gmra.mxu3 %vm437_vm9, %v814_v18 }
 0x4cc   :  { %v776_v19 = vpop.f32.mrf.mxu2 }
 0x4cd   :  { %1172 = vmatmul.msk.f32.vlgmr.msra.gmra.mxu2 %vm437_vm9, %v776_v19 }
 0x4d4   :  { %v779_v20 = vpop.f32.mrf.mxu2 }
 0x4d5   :  { %1173 = vmatmul.msk.f32.gmra.mxu2 %vm437_vm9, %v779_v20  ;;  %v1083_v20 = vld [vmem:[%s1813_s9 + $0x38] sm:$0xff] }
 0x4d6   :  { %1099 = vmatpush.msra.mxu1 %v1083_v20 }
 0x4e8   :  { %v706_v14 = vpop.f32.mrf.mxu0  ;;  %v741_v21 = vpop.f32.mrf.mxu1 }
 0x4e9   :  { %1168 = vmatmul.msk.f32.vlgmr.msrb.gmra.mxu0 %vm437_vm9, %v706_v14  ;;  %1170 = vmatmul.msk.f32.vlgmr.msrb.gmra.mxu1 %vm437_vm9, %v741_v21  ;;  %v1082_v14 = vld [vmem:[%s1813_s9 + $0x30] sm:$0xff]  ;;  %v1081_v21 = vld [vmem:[%s1813_s9 + $0x28] sm:$0xff] }
 0x4ea   :  { %1100 = vmatpush.msra.mxu1 %v1082_v14 }
 0x4ec   :  { %1101 = vmatpush.msra.mxu1 %v1081_v21 }
 0x4f0   :  { %v709_v8 = vpop.f32.mrf.mxu0  ;;  %v744_v22 = vpop.f32.mrf.mxu1 }
 0x4f1   :  { %1169 = vmatmul.msk.f32.gmra.mxu0 %vm437_vm9, %v709_v8  ;;  %1171 = vmatmul.msk.f32.gmra.mxu1 %vm437_vm9, %v744_v22  ;;  %v1080_v22 = vld [vmem:[%s1813_s9 + $0x20] sm:$0xff] }
 0x4f2   :  { %1102 = vmatpush.msra.mxu1 %v1080_v22 }
 0x534   :  { %v931_v25 = vpop.f32.mrf.mxu3 }
 0x535   :  { %v942_v54 = vsel %vm40_vm0, %v931_v25, 0.0  ;;  %v1078_v25 = vld [vmem:[%s1813_s9 + $0x10] sm:$0xff] }
 0x53c   :  { %v934_v36 = vpop.f32.mrf.mxu3 }
 0x53d   :  { %v949_v42 = vsel %vm40_vm0, %v934_v36, 0.0 }
 0x550   :  { %v902_v23 = vpop.f32.mrf.mxu2 }
 0x551   :  { %v940_v29 = vsel %vm40_vm0, %v902_v23, 0.0  ;;  %v1079_v23 = vld [vmem:[%s1813_s9 + $0x18] sm:$0xff] }
 0x552   :  { %1103 = vmatpush.msra.mxu1 %v1079_v23 }
 0x554   :  { %1104 = vmatpush.msra.mxu1 %v1078_v25 }
 0x558   :  { %v905_v7 = vpop.f32.mrf.mxu2 }
 0x559   :  { %v947_v39 = vsel %vm40_vm0, %v905_v7, 0.0 }
 0x566   :  { %v844_v26 = vpop.f32.mrf.mxu0  ;;  %v873_v5 = vpop.f32.mrf.mxu1 }
 0x567   :  { %v937_v27 = vsel %vm40_vm0, %v844_v26, 0.0  ;;  %v938_v28 = vsel %vm40_vm0, %v873_v5, 0.0  ;;  %v1077_v26 = vld [vmem:[%s1813_s9 + $0x8] sm:$0xff] }
 0x568   :  { %v939_v17 = vadd.f32 %v938_v28, %v937_v27  ;;  %1105 = vmatpush.msra.mxu1 %v1077_v26 }
 0x56a   :  { %v941_v30 = vadd.f32 %v940_v29, %v939_v17  ;;  %v1076_v17 = vld [vmem:[%s1813_s9] sm:$0xff]  ;;  %s1307_s9 = smov [#allocation2]  }
 0x56b   :  { %1106 = vmatpush.msra.mxu1 %v1076_v17  ;;  %s1122_s30 = sshll.u32 %s1307_s9, 4  ;;  %s1123_s30 = int_to_ptr.vmem [resolvable:$true] %s1122_s30 }
 0x56c   :  { %v943_v55 = vadd.f32 %v942_v54, %v941_v30 }
 0x56e   :  { %v847_v31 = vpop.f32.mrf.mxu0  ;;  %v876_v32 = vpop.f32.mrf.mxu1  ;;  %v1732_v33 = vadd.f32 %v943_v55, %v1374_v2  ;;  %v1272_v2 = vld [vmem:[%s1804_s0 + $0x8] sm:$0xff] }
 0x56f   :  { %v944_v34 = vsel %vm40_vm0, %v847_v31, 0.0  ;;  %v945_v35 = vsel %vm40_vm0, %v876_v32, 0.0 }
 0x570   :  { %v946_v37 = vadd.f32 %v945_v35, %v944_v34  ;;  %v953_v4 = vmul.f32 %v1732_v33, %v1732_v33 }
 0x572   :  { %v948_v40 = vadd.f32 %v947_v39, %v946_v37  ;;  %v955_v41 = vsel %vm40_vm0, %v953_v4, 0.0 }
 0x573   :  { %956 = vadd.xlane.f32.xlu1 %v955_v41 }
 0x574   :  { %v950_v43 = vadd.f32 %v949_v42, %v948_v40 }
 0x576   :  { %v1744_v38 = vadd.f32 %v1272_v2, %v950_v43 }
 0x578   :  { %v954_v44 = vmul.f32 %v1744_v38, %v1744_v38 }
 0x57a   :  { %v958_v45 = vsel %vm40_vm0, %v954_v44, 0.0 }
 0x57b   :  { %959 = vadd.xlane.f32.xlu2 %v958_v45 }
 0x5e6   :  { %v957_v3 = vpop.xlane.xlu1 %956 }
 0x5e7   :  { %v961_v49 = vmul.f32 %v957_v3, %v1416_v24 }
 0x5e9   :  { %v963_v50 = vadd.f32 1e-06, %v961_v49 }
 0x5eb   :  { %1260 = vrsqrt.f32 %v963_v50  ;;  %vm971_vm12 = vweird.f32 %v963_v50 }
 0x5ee   :  { %v960_v51 = vpop.xlane.xlu2 %959 }
 0x5ef   :  { %v962_v52 = vmul.f32 %v960_v51, %v1416_v24 }
 0x5f1   :  { %v1261_v53 = vpop.eup %1260  ;;  %v964_v59 = vadd.f32 1e-06, %v962_v52 }
 0x5f2   :  { %v966_v60 = vmul.f32 %v1261_v53, %v963_v50  ;;  %vm972_vm11 = vweird.f32 %v1261_v53 }
 0x5f3   :  { %1262 = vrsqrt.f32 %v964_v59  ;;  %vm973_vm13 = vmor %vm971_vm12, %vm972_vm11  ;;  %vm981_vm15 = vweird.f32 %v964_v59 }
 0x5f4   :  { %v967_v63 = vmul.f32 %v1261_v53, %v966_v60 }
 0x5f6   :  { %v968_v56 = vmul.f32 0.5, %v967_v63 }
 0x5f8   :  { %v969_v1 = vsub.f32 1.5, %v968_v56 }
 0x5f9   :  { %v1263_v58 = vpop.eup %1262 }
 0x5fa   :  { %v970_v61 = vmul.f32 %v1261_v53, %v969_v1  ;;  %v976_v6 = vmul.f32 %v1263_v58, %v964_v59  ;;  %vm982_vm14 = vweird.f32 %v1263_v58 }
 0x5fb   :  { %vm983_vm1 = vmor %vm981_vm15, %vm982_vm14 }
 0x5fc   :  { %v974_v57 = vsel %vm973_vm13, %v1261_v53, %v970_v61  ;;  %v977_v10 = vmul.f32 %v1263_v58, %v976_v6 }
 0x5fd   :  { %v985_v24 = vmul.f32 %v974_v57, %v1732_v33 }
 0x5fe   :  { %v978_v11 = vmul.f32 0.5, %v977_v10 }
 0x5ff   :  { %v991_v62 = vmul.f32 %v1221_v9, %v985_v24 }
 0x600   :  { %v979_v12 = vsub.f32 1.5, %v978_v11 }
 0x601   :  { %1176 = vmatmul.msk.f32.vlgmr.msra.gmra.mxu0 %vm40_vm0, %v991_v62 }
 0x602   :  { %v980_v13 = vmul.f32 %v1263_v58, %v979_v12 }
 0x604   :  { %v984_v15 = vsel %vm983_vm1, %v1263_v58, %v980_v13 }
 0x605   :  { %v986_v16 = vmul.f32 %v984_v15, %v1744_v38 }
 0x607   :  { %v992_v18 = vmul.f32 %v1221_v9, %v986_v16 }
 0x609   :  { %1177 = vmatmul.msk.f32.gmra.mxu0 %vm40_vm0, %v992_v18 }
 0x67e   :  { %v1020_v19 = vpop.f32.mrf.mxu0 }
 0x67f   :  { %1068 = vrot.lane.b32.xlu2 %v1020_v19, %s1306_s5  ;;  %v1178_v5 = vmul.f32 -1.442695, %v1020_v19 }
 0x681   :  { %1264 = vpow2.f32 %v1178_v5 }
 0x686   :  { %v1023_v8 = vpop.f32.mrf.mxu0 }
 0x687   :  { %1070 = vrot.lane.b32.xlu0 %v1023_v8, %s1306_s5  ;;  %v1265_v27 = vpop.eup %1264  ;;  %v1179_v55 = vmul.f32 -1.442695, %v1023_v8 }
 0x688   :  { %v1032_v28 = vadd.f32 1.0, %v1265_v27 }
 0x68a   :  { %1266 = vrcp.f32 %v1032_v28  ;;  %v1045_v32 = vand.u32 2147483648, %v1032_v28  ;;  %vm1039_vm3 = vweird.f32 %v1032_v28  ;;  %v1043_v34 = vand.u32 2147483647, %v1032_v28 }
 0x68b   :  { %1268 = vpow2.f32 %v1179_v55 }
 0x68c   :  { %v1046_v37 = vor.u32 1.1754944e-38, %v1045_v32  ;;  %vm1044_vm5 = vcmp.eq.f32.partialorder %v1043_v34, 8.507059e+37 }
 0x690   :  { %v1267_v29 = vpop.eup %1266 }
 0x691   :  { %v1035_v30 = vmul.f32 %v1267_v29, %v1032_v28  ;;  %vm1040_vm2 = vweird.f32 %v1267_v29  ;;  %v1269_v35 = vpop.eup %1268 }
 0x692   :  { %vm1041_vm4 = vmor %vm1039_vm3, %vm1040_vm2  ;;  %v1033_v4 = vadd.f32 1.0, %v1269_v35 }
 0x693   :  { %v1036_v54 = vsub.f32 1.0, %v1035_v30 }
 0x694   :  { %1270 = vrcp.f32 %v1033_v4  ;;  %v1060_v47 = vand.u32 2147483648, %v1033_v4  ;;  %vm1054_vm8 = vweird.f32 %v1033_v4  ;;  %v1058_v48 = vand.u32 2147483647, %v1033_v4 }
 0x695   :  { %v1037_v7 = vmul.f32 %v1267_v29, %v1036_v54 }
 0x696   :  { %v1061_v3 = vor.u32 1.1754944e-38, %v1060_v47  ;;  %vm1059_vm10 = vcmp.eq.f32.partialorder %v1058_v48, 8.507059e+37 }
 0x697   :  { %v1038_v31 = vadd.f32 %v1267_v29, %v1037_v7 }
 0x699   :  { %v1042_v36 = vsel %vm1041_vm4, %v1267_v29, %v1038_v31 }
 0x69a   :  { %v1047_v39 = vsel %vm1044_vm5, %v1046_v37, %v1042_v36  ;;  %v1271_v43 = vpop.eup %1270 }
 0x69b   :  { %v1064_v40 = vmul.f32 %v1047_v39, %v1020_v19  ;;  %v1050_v2 = vmul.f32 %v1271_v43, %v1033_v4  ;;  %vm1055_vm7 = vweird.f32 %v1271_v43 }
 0x69c   :  { %vm1056_vm9 = vmor %vm1054_vm8, %vm1055_vm7 }
 0x69d   :  { %v1051_v44 = vsub.f32 1.0, %v1050_v2 }
 0x69f   :  { %v1052_v45 = vmul.f32 %v1271_v43, %v1051_v44 }
 0x6a1   :  { %v1053_v46 = vadd.f32 %v1271_v43, %v1052_v45 }
 0x6a3   :  { %v1057_v0 = vsel %vm1056_vm9, %v1271_v43, %v1053_v46 }
 0x6a4   :  { %v1062_v49 = vsel %vm1059_vm10, %v1061_v3, %v1057_v0 }
 0x6a5   :  { %v1065_v50 = vmul.f32 %v1062_v49, %v1023_v8 }
 0x6d9   :  { %v1069_v41 = vpop.permute.xlu2 %1068 }
 0x6da   :  { %v1074_v42 = vmul.f32 %v1069_v41, %v1064_v40 }
 0x6dc   :  { %1180 = vmatmul.msk.f32.vlgmr.msra.gmra.mxu1 %vm1084_vm6, %v1074_v42 }
 0x6f9   :  { %v1071_v51 = vpop.permute.xlu0 %1070 }
 0x6fa   :  { %v1075_v52 = vmul.f32 %v1071_v51, %v1065_v50 }
 0x6fc   :  { %1181 = vmatmul.msk.f32.gmra.mxu1 %vm1084_vm6, %v1075_v52 }
 0x759   :  { %v1108_v53 = vpop.f32.mrf.mxu1 }
 0x75a   :  { %v1114_v59 = vadd.f32 %v1108_v53, %v1732_v33 }
 0x75c   :  { %1116 = vst.msk [vmem:[#allocation2] sm:$0xff] %vm40_vm0, %v1114_v59 }
 0x779   :  { %v1111_v60 = vpop.f32.mrf.mxu1 }
 0x77a   :  { %v1115_v63 = vadd.f32 %v1111_v60, %v1744_v38 }
 0x77c   :  { %1117 = vst.msk [vmem:[#allocation2 + $0x8] sm:$0xff] %vm40_vm0, %v1115_v63 }
 0x77d   :  { %1130 = dma.vmem_to_hbm [thread:$0]  %s1123_s30, 256, %s1125_s14, [#allocation3], %s1308_s15, %s1308_s15, %s1302_s13  }
 0x77e   :  { %1297 = dma.done.wait [#allocation3], 256  }
 0x77f   :  { %1298 = vsyncadd [#allocation3], 4294967040 }
 0x780   :  { %1135 = vsyncpa [#allocation3], 1 }

</bundles_post_ra>
